<compile_context>
chip_gen: v6e
topology: v6e:2x2x1
jax: 0.10.0
libtpu: 0.0.40
codegen_flags: <defaults>
</compile_context>

<pallas_src>
import jax
import jax.numpy as jnp
from jax.experimental import pallas as pl
from jax.experimental.pallas import tpu as pltpu


def _softplus(v):
    # torch.nn.Softplus(beta=1, threshold=20), numerically stable form.
    return jnp.where(v > 20.0, v,
                     jnp.maximum(v, 0.0) + jnp.log1p(jnp.exp(-jnp.abs(v))))


def podnn_kernel(x_ref, sp_ref, w2_ref, w3_ref, w4_ref, b4_ref, out_ref):
    # sp_ref packs (w1 row, b1, b2, b3) as a (4, h) slab.
    x = x_ref[...]                       # (TB, 1)
    w1 = sp_ref[0:1, :]                  # (1, h)
    b1 = sp_ref[1:2, :]                  # (1, h)
    b2 = sp_ref[2:3, :]                  # (1, h)
    b3 = sp_ref[3:4, :]                  # (1, h)

    # Layer 1: K=1 "matmul" done as a VPU broadcast multiply-add.
    h = _softplus(x * w1 + b1)                                        # (TB, h)

    # Layers 2 & 3: MXU matmuls + Softplus (exp/log1p -> EUP slot).
    h = _softplus(jnp.dot(h, w2_ref[...],
                          preferred_element_type=jnp.float32) + b2)   # (TB, h)
    h = _softplus(jnp.dot(h, w3_ref[...],
                          preferred_element_type=jnp.float32) + b3)   # (TB, h)

    # Last Linear with the coefficient scaler and POD basis folded in.
    out_ref[...] = jnp.dot(h, w4_ref[...],
                           preferred_element_type=jnp.float32) + b4_ref[...]


def podnn_forward(x, params, *, tb_max=1024):
    """x: (B, 1) f32. Returns (B, N) f32, matching the PyTorch module."""
    (w1, b1, w2, b2, w3, b3, w4, b4, mean, std, basis) = params
    B = x.shape[0]
    h = w2.shape[0]
    N = basis.shape[1]

    # ---- offline algebraic folding of PODBlock.expand into the last Linear ----
    w4p = (w4 * std) @ basis                   # (h, N)
    b4p = (b4 * std + mean) @ basis            # (1, N)

    # ---- pad field dim to a multiple of 128 (lane-dense, unmasked stores) ----
    n_pad = ((N + 127) // 128) * 128
    if n_pad != N:
        w4p = jnp.pad(w4p, ((0, 0), (0, n_pad - N)))
        b4p = jnp.pad(b4p, ((0, 0), (0, n_pad - N)))

    # ---- pack tiny row params into a single operand (one DMA) ----
    small = jnp.concatenate(
        [w1.reshape(1, h), b1.reshape(1, h), b2.reshape(1, h), b3.reshape(1, h)],
        axis=0)                                # (4, h)

    # ---- batch tiling (sublane-aligned, padded to a whole number of tiles) ----
    tb = min(tb_max, max(8, ((B + 7) // 8) * 8))
    b_pad = ((B + tb - 1) // tb) * tb
    xp = jnp.pad(x, ((0, b_pad - B), (0, 0))) if b_pad != B else x
    grid = (b_pad // tb,)

    out = pl.pallas_call(
        podnn_kernel,
        out_shape=jax.ShapeDtypeStruct((b_pad, n_pad), jnp.float32),
        grid=grid,
        in_specs=[
            pl.BlockSpec((tb, 1), lambda i: (i, 0)),         # x: tiled over batch
            pl.BlockSpec((4, h), lambda i: (0, 0)),          # packed small params (resident)
            pl.BlockSpec((h, h), lambda i: (0, 0)),          # W2 (resident)
            pl.BlockSpec((h, h), lambda i: (0, 0)),          # W3 (resident)
            pl.BlockSpec((h, n_pad), lambda i: (0, 0)),      # folded W4' (resident)
            pl.BlockSpec((1, n_pad), lambda i: (0, 0)),      # folded b4' (resident)
        ],
        out_specs=pl.BlockSpec((tb, n_pad), lambda i: (i, 0)),
        compiler_params=pltpu.CompilerParams(
            dimension_semantics=("parallel",),
            vmem_limit_bytes=32 * 1024 * 1024),
    )(xp, small, w2, w3, w4p, b4p)

    return out[:B, :N]


def make_params(key, input_dim, layers, pod_rank, field_dim):
    """Deterministic parameter init (PyTorch Linear-style uniform bounds)."""
    dims = [input_dim] + list(layers) + [pod_rank]
    params = []
    keys = jax.random.split(key, 2 * (len(dims) - 1) + 3)
    ki = 0
    for i in range(len(dims) - 1):
        fan_in, fan_out = dims[i], dims[i + 1]
        bound = 1.0 / jnp.sqrt(jnp.float32(fan_in))
        w = jax.random.uniform(keys[ki], (fan_in, fan_out), jnp.float32,
                               -bound, bound); ki += 1
        b = jax.random.uniform(keys[ki], (1, fan_out), jnp.float32,
                               -bound, bound); ki += 1
        params += [w, b]
    # POD coefficient scaler (mean/std per rank) and POD basis (rank, N).
    mean = jax.random.normal(keys[ki], (1, pod_rank), jnp.float32); ki += 1
    std = 0.5 + jax.random.uniform(keys[ki], (1, pod_rank), jnp.float32); ki += 1
    basis = jax.random.normal(keys[ki], (pod_rank, field_dim), jnp.float32)
    basis = basis / jnp.linalg.norm(basis, axis=1, keepdims=True)  # row-normalized modes
    params += [mean, std, basis]
    return tuple(params)


def podnn_reference(x, params):
    """Pure-JAX reference with the *unfolded* (PyTorch-order) math."""
    (w1, b1, w2, b2, w3, b3, w4, b4, mean, std, basis) = params
    h = _softplus(x @ w1 + b1)
    h = _softplus(h @ w2 + b2)
    h = _softplus(h @ w3 + b3)
    coeff = h @ w4 + b4
    coeff = coeff * std + mean
    return coeff @ basis


if __name__ == "__main__":
    # Small shapes consistent with the module: scalar parameter input,
    # 3 hidden layers of 32, POD rank 8, field dimension 100 (exercises the
    # lane-padding path). Batch 24 with tb_max=8 exercises a multi-step grid.
    B, INPUT_DIM, LAYERS, POD_RANK, FIELD_N = 24, 1, (32, 32, 32), 8, 100

    key = jax.random.PRNGKey(0)
    k_x, k_p = jax.random.split(key)
    x = jax.random.uniform(k_x, (B, INPUT_DIM), jnp.float32)
    params = make_params(k_p, INPUT_DIM, LAYERS, POD_RANK, FIELD_N)

    out = podnn_forward(x, params, tb_max=8)
    out = jax.block_until_ready(out)

    ref = podnn_reference(x, params)
    assert out.shape == (B, FIELD_N)
    # Folding std/mean/basis into W4 changes rounding order slightly -> 1e-3 tol.
    assert jnp.allclose(out, ref, atol=1e-3, rtol=1e-3)

    print("KERNEL_OK")
</pallas_src>

<mosaic_0001>
module attributes {stable_mosaic.version = 11 : i64} {
  func.func @podnn_kernel(%arg0: i32, %arg1: memref<8x1xf32, #tpu.memory_space<vmem>>, %arg2: memref<4x32xf32, #tpu.memory_space<vmem>>, %arg3: memref<32x32xf32, #tpu.memory_space<vmem>>, %arg4: memref<32x32xf32, #tpu.memory_space<vmem>>, %arg5: memref<32x128xf32, #tpu.memory_space<vmem>>, %arg6: memref<1x128xf32, #tpu.memory_space<vmem>>, %arg7: memref<8x128xf32, #tpu.memory_space<vmem>>) attributes {dimension_semantics = [#tpu.dimension_semantics<parallel>], iteration_bounds = array<i64: 3>, scalar_prefetch = 0 : i64, scratch_operands = 0 : i64, tpu.core_type = #tpu.core_type<tc>, window_params = [{transform_indices = @transform_0, window_bounds = array<i64: 8, 1>}, {pipeline_mode = #tpu.pipeline_mode<synchronous>, transform_indices = @transform_1, window_bounds = array<i64: 4, 32>}, {pipeline_mode = #tpu.pipeline_mode<synchronous>, transform_indices = @transform_2, window_bounds = array<i64: 32, 32>}, {pipeline_mode = #tpu.pipeline_mode<synchronous>, transform_indices = @transform_3, window_bounds = array<i64: 32, 32>}, {pipeline_mode = #tpu.pipeline_mode<synchronous>, transform_indices = @transform_4, window_bounds = array<i64: 32, 128>}, {pipeline_mode = #tpu.pipeline_mode<synchronous>, transform_indices = @transform_5, window_bounds = array<i64: 1, 128>}, {transform_indices = @transform_6, window_bounds = array<i64: 8, 128>}]} {
    %c0 = arith.constant 0 : index
    %c0_0 = arith.constant 0 : index
    %0 = vector.load %arg1[%c0, %c0_0] : memref<8x1xf32, #tpu.memory_space<vmem>>, vector<8x1xf32>
    %c0_1 = arith.constant 0 : index
    %c0_2 = arith.constant 0 : index
    %1 = vector.load %arg2[%c0_1, %c0_2] : memref<4x32xf32, #tpu.memory_space<vmem>>, vector<1x32xf32>
    %c1 = arith.constant 1 : index
    %c0_3 = arith.constant 0 : index
    %2 = vector.load %arg2[%c1, %c0_3] : memref<4x32xf32, #tpu.memory_space<vmem>>, vector<1x32xf32>
    %c2 = arith.constant 2 : index
    %c0_4 = arith.constant 0 : index
    %3 = vector.load %arg2[%c2, %c0_4] : memref<4x32xf32, #tpu.memory_space<vmem>>, vector<1x32xf32>
    %c3 = arith.constant 3 : index
    %c0_5 = arith.constant 0 : index
    %4 = vector.load %arg2[%c3, %c0_5] : memref<4x32xf32, #tpu.memory_space<vmem>>, vector<1x32xf32>
    %5 = vector.broadcast %0 : vector<8x1xf32> to vector<8x32xf32>
    %6 = vector.broadcast %1 : vector<1x32xf32> to vector<8x32xf32>
    %7 = arith.mulf %5, %6 : vector<8x32xf32>
    %8 = vector.broadcast %2 : vector<1x32xf32> to vector<8x32xf32>
    %9 = arith.addf %7, %8 : vector<8x32xf32>
    %cst = arith.constant 2.000000e+01 : f32
    %10 = vector.broadcast %cst : f32 to vector<8x32xf32>
    %11 = arith.cmpf ogt, %9, %10 : vector<8x32xf32>
    %cst_6 = arith.constant 0.000000e+00 : f32
    %12 = vector.broadcast %cst_6 : f32 to vector<8x32xf32>
    %13 = arith.maximumf %9, %12 : vector<8x32xf32>
    %14 = math.absf %9 : vector<8x32xf32>
    %cst_7 = arith.constant 0.000000e+00 : f32
    %15 = vector.broadcast %cst_7 : f32 to vector<8x32xf32>
    %16 = arith.subf %15, %14 : vector<8x32xf32>
    %17 = math.exp %16 : vector<8x32xf32>
    %18 = math.log1p %17 : vector<8x32xf32>
    %19 = arith.addf %13, %18 : vector<8x32xf32>
    %20 = arith.select %11, %9, %19 : vector<8x32xi1>, vector<8x32xf32>
    %c0_8 = arith.constant 0 : index
    %c0_9 = arith.constant 0 : index
    %21 = vector.load %arg3[%c0_8, %c0_9] : memref<32x32xf32, #tpu.memory_space<vmem>>, vector<32x32xf32>
    %cst_10 = arith.constant dense<0.000000e+00> : vector<8x32xf32>
    %22 = tpu.matmul %20, %21, %cst_10 {dimension_numbers = #tpu.dot_dimension_numbers<[1], [0], [0], [1], [0, 0, 1, 1], [], []>} : vector<8x32xf32>, vector<32x32xf32>, vector<8x32xf32> -> vector<8x32xf32>
    %23 = vector.broadcast %3 : vector<1x32xf32> to vector<8x32xf32>
    %24 = arith.addf %22, %23 : vector<8x32xf32>
    %cst_11 = arith.constant 2.000000e+01 : f32
    %25 = vector.broadcast %cst_11 : f32 to vector<8x32xf32>
    %26 = arith.cmpf ogt, %24, %25 : vector<8x32xf32>
    %cst_12 = arith.constant 0.000000e+00 : f32
    %27 = vector.broadcast %cst_12 : f32 to vector<8x32xf32>
    %28 = arith.maximumf %24, %27 : vector<8x32xf32>
    %29 = math.absf %24 : vector<8x32xf32>
    %cst_13 = arith.constant 0.000000e+00 : f32
    %30 = vector.broadcast %cst_13 : f32 to vector<8x32xf32>
    %31 = arith.subf %30, %29 : vector<8x32xf32>
    %32 = math.exp %31 : vector<8x32xf32>
    %33 = math.log1p %32 : vector<8x32xf32>
    %34 = arith.addf %28, %33 : vector<8x32xf32>
    %35 = arith.select %26, %24, %34 : vector<8x32xi1>, vector<8x32xf32>
    %c0_14 = arith.constant 0 : index
    %c0_15 = arith.constant 0 : index
    %36 = vector.load %arg4[%c0_14, %c0_15] : memref<32x32xf32, #tpu.memory_space<vmem>>, vector<32x32xf32>
    %cst_16 = arith.constant dense<0.000000e+00> : vector<8x32xf32>
    %37 = tpu.matmul %35, %36, %cst_16 {dimension_numbers = #tpu.dot_dimension_numbers<[1], [0], [0], [1], [0, 0, 1, 1], [], []>} : vector<8x32xf32>, vector<32x32xf32>, vector<8x32xf32> -> vector<8x32xf32>
    %38 = vector.broadcast %4 : vector<1x32xf32> to vector<8x32xf32>
    %39 = arith.addf %37, %38 : vector<8x32xf32>
    %cst_17 = arith.constant 2.000000e+01 : f32
    %40 = vector.broadcast %cst_17 : f32 to vector<8x32xf32>
    %41 = arith.cmpf ogt, %39, %40 : vector<8x32xf32>
    %cst_18 = arith.constant 0.000000e+00 : f32
    %42 = vector.broadcast %cst_18 : f32 to vector<8x32xf32>
    %43 = arith.maximumf %39, %42 : vector<8x32xf32>
    %44 = math.absf %39 : vector<8x32xf32>
    %cst_19 = arith.constant 0.000000e+00 : f32
    %45 = vector.broadcast %cst_19 : f32 to vector<8x32xf32>
    %46 = arith.subf %45, %44 : vector<8x32xf32>
    %47 = math.exp %46 : vector<8x32xf32>
    %48 = math.log1p %47 : vector<8x32xf32>
    %49 = arith.addf %43, %48 : vector<8x32xf32>
    %50 = arith.select %41, %39, %49 : vector<8x32xi1>, vector<8x32xf32>
    %c0_20 = arith.constant 0 : index
    %c0_21 = arith.constant 0 : index
    %51 = vector.load %arg5[%c0_20, %c0_21] : memref<32x128xf32, #tpu.memory_space<vmem>>, vector<32x128xf32>
    %cst_22 = arith.constant dense<0.000000e+00> : vector<8x128xf32>
    %52 = tpu.matmul %50, %51, %cst_22 {dimension_numbers = #tpu.dot_dimension_numbers<[1], [0], [0], [1], [0, 0, 1, 1], [], []>} : vector<8x32xf32>, vector<32x128xf32>, vector<8x128xf32> -> vector<8x128xf32>
    %c0_23 = arith.constant 0 : index
    %c0_24 = arith.constant 0 : index
    %53 = vector.load %arg6[%c0_23, %c0_24] : memref<1x128xf32, #tpu.memory_space<vmem>>, vector<1x128xf32>
    %54 = vector.broadcast %53 : vector<1x128xf32> to vector<8x128xf32>
    %55 = arith.addf %52, %54 : vector<8x128xf32>
    %c0_25 = arith.constant 0 : index
    %c0_26 = arith.constant 0 : index
    %56 = vector.load %arg7[%c0_25, %c0_26] : memref<8x128xf32, #tpu.memory_space<vmem>>, vector<8x128xf32>
    tpu.vector_store %arg7[%c0_25, %c0_26], %55 {strides = array<i32>} : memref<8x128xf32, #tpu.memory_space<vmem>>, vector<8x128xf32>,
    return
  }
  func.func @transform_0(%arg0: i32) -> (i32, i32) {
    %c0_i32 = arith.constant 0 : i32
    %c0_i32_0 = arith.constant 0 : i32
    return %arg0, %c0_i32 : i32, i32
  }
  func.func @transform_1(%arg0: i32) -> (i32, i32) {
    %c0_i32 = arith.constant 0 : i32
    %c0_i32_0 = arith.constant 0 : i32
    %c0_i32_1 = arith.constant 0 : i32
    return %c0_i32, %c0_i32_0 : i32, i32
  }
  func.func @transform_2(%arg0: i32) -> (i32, i32) {
    %c0_i32 = arith.constant 0 : i32
    %c0_i32_0 = arith.constant 0 : i32
    %c0_i32_1 = arith.constant 0 : i32
    return %c0_i32, %c0_i32_0 : i32, i32
  }
  func.func @transform_3(%arg0: i32) -> (i32, i32) {
    %c0_i32 = arith.constant 0 : i32
    %c0_i32_0 = arith.constant 0 : i32
    %c0_i32_1 = arith.constant 0 : i32
    return %c0_i32, %c0_i32_0 : i32, i32
  }
  func.func @transform_4(%arg0: i32) -> (i32, i32) {
    %c0_i32 = arith.constant 0 : i32
    %c0_i32_0 = arith.constant 0 : i32
    %c0_i32_1 = arith.constant 0 : i32
    return %c0_i32, %c0_i32_0 : i32, i32
  }
  func.func @transform_5(%arg0: i32) -> (i32, i32) {
    %c0_i32 = arith.constant 0 : i32
    %c0_i32_0 = arith.constant 0 : i32
    %c0_i32_1 = arith.constant 0 : i32
    return %c0_i32, %c0_i32_0 : i32, i32
  }
  func.func @transform_6(%arg0: i32) -> (i32, i32) {
    %c0_i32 = arith.constant 0 : i32
    %c0_i32_0 = arith.constant 0 : i32
    return %arg0, %c0_i32 : i32, i32
  }
}

</mosaic_0001>

<bundles_post_ra>
// kernel: tpu_custom_call.1
= control target key start
LH: loop header
LB: loop body
LE: loop exit
PB: predicated region body
PF: predicated region fallthrough
CT: control target
= control target key end

     0   :  { %11 = vsyncpa [#allocation3], 0  ;;  %s1242_s0 = inlined_call_operand.vmem [shape: f32[24,1], index: 0, kind: input, shape index: {}]   ;;  %s1243_s1 = inlined_call_operand.hbm [shape: f32[4,32], index: 1, kind: input, shape index: {}]   ;;  %s1244_s2 = inlined_call_operand.hbm [shape: f32[32,32], index: 2, kind: input, shape index: {}]   ;;  %s1245_s3 = inlined_call_operand.hbm [shape: f32[32,32], index: 3, kind: input, shape index: {}]   ;;  %s1246_s4 = inlined_call_operand.vmem [shape: f32[32,128], index: 4, kind: input, shape index: {}]   ;;  %s1247_s5 = inlined_call_operand.vmem [shape: f32[1,128], index: 5, kind: input, shape index: {}]   ;;  %s1248_s6 = inlined_call_operand.hbm [shape: f32[24,128], index: 6, kind: output, shape index: {}]  }
   0x1   :  { %12 = vsyncpa [#allocation6], 0 }
   0x2   :  { %13 = vsyncpa [#allocation4], 0 }
   0x3   :  { %15 = vsyncpa [#allocation4 + $0x1], 0  ;;  %s1064_s21 = smov 0   ;;  %s1066_s22 = smov 0  }
   0x4   :  { %s1068_s23 = smov 0   ;;  %s1070_s24 = smov 0  }
   0x5 LB: > { %s1085_s25 = sadd.s32 4294967295, %s1018_s24   ;;  %s712_s26 = sadd.s32 4294967294, %s1018_s24   ;;  %s1018_s24 = sphi %s1070_s24, %s1264_s24   ;;  %s1014_s23 = sphi %s1068_s23, %s1263_s23   ;;  %s1010_s22 = sphi %s1066_s22, %s1262_s22   ;;  %s1006_s21 = sphi %s1064_s21, %s1261_s21  }
   0x6   : > { %s1089_s27 = sadd.s32 1, %s1018_s24   ;;  %s159_s28 = sadd.s32 1, %s1014_s23 }
   0x7   : > { %s156_s29 = ssub.s32 %s1018_s24, %s1089_s27  ;;  %p169_p0 = scmp.ne.s32.totalorder %s1014_s23, %s1010_s22 }
   0x8   : > { %p157_p1 = scmp.eq.s32.totalorder %s156_s29, 0  ;;  %p170_p2 = scmp.eq.s32.totalorder %s1085_s25, 2 }
   0x9   : > { %p175_p3 = scmp.ne.s32.totalorder %s1010_s22, %s1006_s21  ;;  %p176_p4 = scmp.eq.s32.totalorder %s712_s26, 2 }
   0xa   : > { %s1100_s30 = scalar_select %p157_p1, %s1014_s23, %s159_s28  }
   0xb   : > { %p1102_p5 = por %p170_p2, %p169_p0  ;;  %p1106_p6 = por %p176_p4, %p175_p3 }
   0xc   : > { %p713_p7 = scmp.ge.s32.totalorder %s1018_s24, 1  ;;  %p183_p8 = scmp.lt.s32.totalorder %s1018_s24, 4 }
   0xd   : > { %s1251_s7 = scalar_select %p1102_p5, 1, 0 }
   0xe   : > { %s1252_s8 = scalar_select %p1106_p6, 1, 0 }
   0xf   : > { %p1249_p9 = scmp.eq.s32.totalorder %s1085_s25, 0  ;;  %p1113_p10 = pnand %p713_p7, %p183_p8 }
  0x10   : > { %s1020_s10 = smov [#allocation5]   ;;  %s1021_s13 = smov [#allocation2]  }
  0x11   : > { %s206_s11 = sshll.u32 %s1020_s10, 4  ;;  %p798_p11 = pneg %p1113_p10  ;;  %s207_s11 = int_to_ptr.vmem [resolvable:$true] %s206_s11 }
  0x12   : > { %s196_s14 = sshll.u32 %s1021_s13, 4  ;;  %s1022_s15 = smov [#allocation7]   ;;  %s197_s14 = int_to_ptr.vmem [resolvable:$true] %s196_s14 }
  0x13   : > { %p1121_p12 = pnand %p1249_p9, %p798_p11  ;;  %s219_s16 = sshll.u32 %s1022_s15, 4  ;;  %s220_s16 = int_to_ptr.vmem [resolvable:$true] %s219_s16 }
  0x14   : > { %s883_s17 = scalar_lea.vmem %s207_s11, 512  ;;  %p891_p3 = scmp.lt.s32.totalorder %s207_s11, %s207_s11 }
  0x15   : > { %p874_p13 = pneg %p1121_p12  ;;  %p884_p0 = scmp.ne.s32.totalorder %s207_s11, %s883_s17 }
  0x16   : > { %p892_p4 = scmp.lt.s32.totalorder %s883_s17, %s883_s17 }
  0x17   : > { %p886_p1 = pnand %p884_p0, %p874_p13 }
  0x18   : > { %p893_p7 = por %p892_p4, %p891_p3 }
  0x19   : > { %p887_p2 = pneg %p886_p1 }
  0x1b   : > { %p894_p8 = pnand %p893_p7, %p887_p2 }
  0x1d   : > { %897 = shalt.err (!%p894_p8)
}
  0x1e   : > { %s1023_s18 = smov 128   ;;  %s1024_s19 = smov 8  }
  0x1f   : > { %804 = dma.hbm_to_vmem [thread:$0]  (!%p1121_p12), %s1244_s2, 512, %s207_s11, [#allocation6], %s1023_s18, %s1023_s18, %s1024_s19  }
  0x20   : > { %s909_s28 = scalar_lea.vmem %s197_s14, 64  ;;  %p917_p9 = scmp.lt.s32.totalorder %s197_s14, %s197_s14 }
  0x21   : > { %p910_p11 = scmp.ne.s32.totalorder %s197_s14, %s909_s28  ;;  %p918_p6 = scmp.lt.s32.totalorder %s909_s28, %s909_s28 }
  0x23   : > { %p912_p0 = pnand %p910_p11, %p874_p13  ;;  %p919_p3 = por %p918_p6, %p917_p9 }
  0x25   : > { %p913_p1 = pneg %p912_p0 }
  0x27   : > { %p920_p2 = pnand %p919_p3, %p913_p1 }
  0x29   : > { %923 = shalt.err (!%p920_p2)
}
  0x2a   : > { %801 = dma.hbm_to_vmem [thread:$0]  (!%p1121_p12), %s1243_s1, 64, %s197_s14, [#allocation3]  }
  0x2b   : > { %s935_s11 = scalar_lea.vmem %s220_s16, 512  ;;  %p943_p11 = scmp.lt.s32.totalorder %s220_s16, %s220_s16 }
  0x2c   : > { %p936_p4 = scmp.ne.s32.totalorder %s220_s16, %s935_s11  ;;  %p944_p0 = scmp.lt.s32.totalorder %s935_s11, %s935_s11 }
  0x2e   : > { %p938_p7 = pnand %p936_p4, %p874_p13  ;;  %p945_p5 = por %p944_p0, %p943_p11 }
  0x30   : > { %p939_p8 = pneg %p938_p7 }
  0x32   : > { %p946_p6 = pnand %p945_p5, %p939_p8 }
  0x34   : > { %949 = shalt.err (!%p946_p6)
}
  0x35   : > { %807 = dma.hbm_to_vmem [thread:$0]  (!%p1121_p12), %s1245_s3, 512, %s220_s16, [#allocation6], %s1023_s18, %s1023_s18, %s1024_s19  }
  0x36   : > { %248 = sbr.rel (%p1113_p10) target bundleno = 922 (0x39a), region = 44  ;;  %p1255_p9 = scmp.eq.s32.totalorder (!%p1113_p10), %s1085_s25, 0 }
  0x3b   : > { %993 = dma.done.wait (%p1255_p9), [#allocation3], 64   ;;  %p1256_p13 = pmov %p1255_p9 }
  0x3c   : > { %p1257_p1 = pmov %p1255_p9 }
  0x3d   : > { %995 = vsyncadd (%p1256_p13), [#allocation3], 4294967232 }
  0x3e   : > { %997 = dma.done.wait (%p1257_p1), [#allocation6], 1024   ;;  %p1258_p5 = pmov %p1257_p1 }
  0x3f   : > { %p285_p3 = scmp.lt.s32.totalorder %s1085_s25, 2  ;;  %v1025_v0 = vmov 0   ;;  %v329_v2 = vld [vmem:[#allocation5 + $0x18] sm:$0xff]  ;;  %v1026_v3 = vmov 0.0   ;;  %v328_v4 = vld [vmem:[#allocation5 + $0x10] sm:$0xff]  ;;  %vm1027_vm0 = vmmov 0  }
  0x40   : > { %999 = vsyncadd (%p1258_p5), [#allocation6], 4294966272  ;;  %859 = vset.pattern.permute.xlu0 %v1025_v0  ;;  %751 = vmatprep.subr.mxu0 %v1026_v3  ;;  %v327_v5 = vld [vmem:[#allocation5 + $0x8] sm:$0xff]  ;;  %v326_v6 = vld [vmem:[#allocation5] sm:$0xff]  ;;  %vm334_vm2 = vcmask 261120   ;;  %s282_s13 = sand.u32 1, %s1010_s22  }
  0x41   : > { %s286_s12 = scalar_select %p285_p3, %s1085_s25, 2  ;;  %759 = vmatprep.mubr.msk.f32.mxu0 %vm1027_vm0, %v1026_v3  ;;  %752 = vmatpush3.msra.mxu0 %v329_v2  ;;  %v724_v7 = vld [vmem:[#allocation2] ss:$0 sm:$0xff]  ;;  %v725_v8 = vld [vmem:[#allocation2 + $0x1] ss:$0 sm:$0xff]  ;;  %v427_v28 = vld [vmem:[#allocation7 + $0x10] sm:$0xff] }
  0x42   : > { %762 = vmatprep.subr.mxu1 %v1026_v3  ;;  %753 = vmatprep.subr.mxu0 %v1026_v3  ;;  %v428_v27 = vld [vmem:[#allocation7 + $0x18] sm:$0xff]  ;;  %v426_v29 = vld [vmem:[#allocation7 + $0x8] sm:$0xff]  ;;  %v425_v30 = vld [vmem:[#allocation7] sm:$0xff]  ;;  %s722_s15 = sshll.u32 %s282_s13, 3  ;;  %s733_s14 = sshll.u32 %s1085_s25, 7 }
  0x43   : > { %s723_s9 = sshll.u32 %s286_s12, 3  ;;  %770 = vmatprep.mubr.msk.f32.mxu1 %vm1027_vm0, %v1026_v3  ;;  %754 = vmatpush3.msra.mxu0 %v328_v4  ;;  %v726_v31 = vld [vmem:[#allocation2 + $0x2] ss:$0 sm:$0xff]  ;;  %v526_v50 = vld [vmem:[%s1246_s4 + $0x18] sm:$0xff]  ;;  %v525_v51 = vld [vmem:[%s1246_s4 + $0x10] sm:$0xff]  ;;  %s284_s16 = scalar_lea.vmem [#allocation8], %s722_s15 }
  0x44   : > { %s288_s17 = scalar_lea.vmem %s1242_s0, %s723_s9  ;;  %755 = vmatprep.subr.mxu0 %v1026_v3  ;;  %763 = vmatpush3.msra.mxu1 %v428_v27  ;;  %v524_v52 = vld [vmem:[%s1246_s4 + $0x8] sm:$0xff]  ;;  %v523_v53 = vld [vmem:[%s1246_s4] sm:$0xff]  ;;  %s1207_s20 = scalar_lea.hbm %s1248_s6, %s733_s14 }
  0x45   : > { %v289_v1 = vld [vmem:[%s288_s17] sm:$0xff]  ;;  %756 = vmatpush3.msra.mxu0 %v327_v5  ;;  %764 = vmatprep.subr.mxu1 %v1026_v3  ;;  %s622_s17 = sshll.u32 %s284_s16, 4  ;;  %s609_s26 = scalar_lea.sflag [#allocation4], %s282_s13  ;;  %s623_s17 = int_to_ptr.vmem [resolvable:$true] %s622_s17 }
  0x46   : > { %296 = vperm.xlu0 %859, %v289_v1   ;;  %757 = vmatprep.subr.mxu0 %v1026_v3  ;;  %v728_v54 = vld [vmem:[#allocation2 + $0x3] ss:$0 sm:$0xff]  ;;  %s950_s28 = scalar_lea.vmem %s623_s17, 128  ;;  %p1259_p12 = scmp.ne.s32.totalorder %s1251_s7, 0 }
  0x47   : > { %758 = vmatpush3.msra.mxu0 %v326_v6  ;;  %765 = vmatpush3.msra.mxu1 %v427_v28  ;;  %p951_p10 = scmp.ne.s32.totalorder %s623_s17, %s950_s28  ;;  %s1028_s29 = smov [#allocation8]  }
  0x48   : > { %773 = vmatprep.subr.mxu0 %v1026_v3  ;;  %766 = vmatprep.subr.mxu1 %v1026_v3  ;;  %s954_s25 = sshll.u32 %s1028_s29, 4  ;;  %s955_s25 = int_to_ptr.vmem [resolvable:$false] %s954_s25 }
  0x49   : > { %767 = vmatpush3.msra.mxu1 %v426_v29  ;;  %p952_p2 = pnand %p951_p10, %p1259_p12  ;;  %s956_s10 = scalar_lea.vmem %s955_s25, 256 }
  0x4a   : > { %768 = vmatprep.subr.mxu1 %v1026_v3  ;;  %p957_p7 = scmp.lt.s32.totalorder %s623_s17, %s955_s25  ;;  %p958_p8 = scmp.lt.s32.totalorder %s956_s10, %s950_s28 }
  0x4b   : > { %769 = vmatpush3.msra.mxu1 %v425_v30  ;;  %p953_p4 = pneg %p952_p2 }
  0x4c   : > { %p959_p11 = por %p958_p8, %p957_p7 }
  0x4e   : > { %p960_p0 = pnand %p959_p11, %p953_p4 }
  0xc1   : > { %v297_v9 = vpop.permute.xlu0 %296 }
  0xc2   : > { %v303_v10 = vmul.f32 %v724_v7, %v297_v9  ;;  %v730_v9 = vld [vmem:[%s1247_s5] ss:$0 sm:$0xff] }
  0xc4   : > { %v308_v11 = vadd.f32 %v725_v8, %v303_v10 }
  0xc6   : > { %v311_v12 = vand.u32 2147483647, %v308_v11  ;;  %v310_v23 = vmax.f32 %v308_v11, 0.0  ;;  %vm309_vm3 = vcmp.gt.f32.partialorder %v308_v11, 20.0 }
  0xc8   : > { %v312_v13 = vsub.f32 0.0, %v311_v12 }
  0xca   : > { %v313_v14 = vmul.f32 1.442695, %v312_v13 }
  0xcc   : > { %860 = vpow2.f32 %v313_v14 }
  0xd9   : > { %v861_v15 = vpop.eup %860 }
  0xda   : > { %v315_v16 = vadd.f32 1.0, %v861_v15  ;;  %v318_v17 = vmul.f32 -0.5, %v861_v15  ;;  %v321_v19 = vand.u32 2147483647, %v861_v15 }
  0xdc   : > { %862 = vlog2.f32 %v315_v16  ;;  %v319_v18 = vadd.f32 1.0, %v318_v17  ;;  %vm322_vm1 = vcmp.lt.f32.partialorder %v321_v19, 0.0004427343 }
  0xde   : > { %v320_v22 = vmul.f32 %v861_v15, %v319_v18 }
  0xe9   : > { %v863_v20 = vpop.eup %862 }
  0xea   : > { %v317_v21 = vmul.f32 0.6931472, %v863_v20 }
  0xec   : > { %v323_v24 = vsel %vm322_vm1, %v320_v22, %v317_v21 }
  0xed   : > { %v324_v25 = vadd.f32 %v323_v24, %v310_v23 }
  0xef   : > { %v325_v26 = vsel %vm309_vm3, %v308_v11, %v324_v25 }
  0xf0   : > { %760 = vmatmul.mubr.msk.f32.vlgmr.msra.gmra.mxu0 %vm334_vm2, %v325_v26 }
  0xf1   : > { %781 = vmatprep.mubr.msk.f32.mxu0 %vm1027_vm0, %v1026_v3  ;;  %774 = vmatpush3.msra.mxu0 %v526_v50 }
  0xf2   : > { %775 = vmatprep.subr.mxu0 %v1026_v3 }
  0xf3   : > { %776 = vmatpush3.msra.mxu0 %v525_v51 }
  0xf4   : > { %777 = vmatprep.subr.mxu0 %v1026_v3 }
  0xf5   : > { %778 = vmatpush3.msra.mxu0 %v524_v52 }
  0xf6   : > { %779 = vmatprep.subr.mxu0 %v1026_v3 }
  0xf7   : > { %780 = vmatpush3.msra.mxu0 %v523_v53 }
 0x1b0   : > { %v404_v32 = vpop.f32.mrf.mxu0 }
 0x1b1   : > { %v405_v33 = vadd.f32 %v726_v31, %v404_v32 }
 0x1b2   : > { %v761_v34 = vpop.f32.mrf.mxu0 }
 0x1b3   : > { %v410_v35 = vand.u32 2147483647, %v405_v33  ;;  %v409_v46 = vmax.f32 %v405_v33, 0.0  ;;  %vm408_vm5 = vcmp.gt.f32.partialorder %v405_v33, 20.0 }
 0x1b5   : > { %v411_v36 = vsub.f32 0.0, %v410_v35 }
 0x1b7   : > { %v412_v37 = vmul.f32 1.442695, %v411_v36 }
 0x1b9   : > { %864 = vpow2.f32 %v412_v37 }
 0x1c6   : > { %v865_v38 = vpop.eup %864 }
 0x1c7   : > { %v414_v39 = vadd.f32 1.0, %v865_v38  ;;  %v417_v40 = vmul.f32 -0.5, %v865_v38  ;;  %v420_v42 = vand.u32 2147483647, %v865_v38 }
 0x1c9   : > { %866 = vlog2.f32 %v414_v39  ;;  %v418_v41 = vadd.f32 1.0, %v417_v40  ;;  %vm421_vm4 = vcmp.lt.f32.partialorder %v420_v42, 0.0004427343 }
 0x1cb   : > { %v419_v45 = vmul.f32 %v865_v38, %v418_v41 }
 0x1d6   : > { %v867_v43 = vpop.eup %866 }
 0x1d7   : > { %v416_v44 = vmul.f32 0.6931472, %v867_v43 }
 0x1d9   : > { %v422_v47 = vsel %vm421_vm4, %v419_v45, %v416_v44 }
 0x1da   : > { %v423_v48 = vadd.f32 %v422_v47, %v409_v46 }
 0x1dc   : > { %v424_v49 = vsel %vm408_vm5, %v405_v33, %v423_v48 }
 0x1dd   : > { %771 = vmatmul.mubr.msk.f32.vlgmr.msra.gmra.mxu1 %vm334_vm2, %v424_v49 }
 0x29d   : > { %v502_v55 = vpop.f32.mrf.mxu1 }
 0x29e   : > { %v503_v56 = vadd.f32 %v728_v54, %v502_v55 }
 0x29f   : > { %v772_v57 = vpop.f32.mrf.mxu1 }
 0x2a0   : > { %v508_v58 = vand.u32 2147483647, %v503_v56  ;;  %v507_v5 = vmax.f32 %v503_v56, 0.0  ;;  %vm506_vm7 = vcmp.gt.f32.partialorder %v503_v56, 20.0 }
 0x2a2   : > { %v509_v59 = vsub.f32 0.0, %v508_v58 }
 0x2a4   : > { %v510_v60 = vmul.f32 1.442695, %v509_v59 }
 0x2a6   : > { %868 = vpow2.f32 %v510_v60 }
 0x2b3   : > { %v869_v61 = vpop.eup %868 }
 0x2b4   : > { %v512_v62 = vadd.f32 1.0, %v869_v61  ;;  %v515_v63 = vmul.f32 -0.5, %v869_v61  ;;  %v518_v1 = vand.u32 2147483647, %v869_v61 }
 0x2b6   : > { %870 = vlog2.f32 %v512_v62  ;;  %v516_v0 = vadd.f32 1.0, %v515_v63  ;;  %vm519_vm6 = vcmp.lt.f32.partialorder %v518_v1, 0.0004427343 }
 0x2b8   : > { %v517_v3 = vmul.f32 %v869_v61, %v516_v0 }
 0x2c3   : > { %v871_v2 = vpop.eup %870 }
 0x2c4   : > { %v514_v4 = vmul.f32 0.6931472, %v871_v2 }
 0x2c6   : > { %v520_v6 = vsel %vm519_vm6, %v517_v3, %v514_v4 }
 0x2c7   : > { %v521_v7 = vadd.f32 %v520_v6, %v507_v5 }
 0x2c9   : > { %v522_v8 = vsel %vm506_vm7, %v503_v56, %v521_v7 }
 0x2ca   : > { %782 = vmatmul.mubr.msk.f32.vlgmr.msra.gmra.mxu0 %vm334_vm2, %v522_v8 }
 0x38a   : > { %v603_v10 = vpop.f32.mrf.mxu0 }
 0x38b   : > { %v604_v11 = vadd.f32 %v730_v9, %v603_v10 }
 0x38c   : > { %v783_v12 = vpop.f32.mrf.mxu0 }
 0x38d   : > { %607 = vst [vmem:[%s284_s16] sm:$0xff] %v604_v11 }
 0x38e   : > { %963 = shalt.err (!%p960_p0)
}
 0x38f   : > { %s964_s11 = scalar_lea.hbm %s1207_s20, 128  ;;  %s968_s12 = scalar_lea.hbm %s1248_s6, 384 }
 0x390   : > { %p965_p6 = scmp.ne.s32.totalorder %s1207_s20, %s964_s11  ;;  %p969_p1 = scmp.lt.s32.totalorder %s1207_s20, %s1248_s6 }
 0x391   : > { %p970_p5 = scmp.lt.s32.totalorder %s968_s12, %s964_s11 }
 0x392   : > { %p966_p9 = pnand %p965_p6, %p1259_p12 }
 0x393   : > { %p971_p3 = por %p970_p5, %p969_p1 }
 0x394   : > { %p967_p13 = pneg %p966_p9 }
 0x396   : > { %p972_p10 = pnand %p971_p3, %p967_p13 }
 0x398   : > { %975 = shalt.err (!%p972_p10)
}
 0x399   : > { %796 = dma.vmem_to_hbm [thread:$0]  (%p1259_p12), %s623_s17, 128, %s1207_s20, %s609_s26  }
 0x39a PF: > { %p818_p2 = scmp.ge.s32.totalorder %s1018_s24, 2  ;;  %s634_s16 = sand.u32 1, %s1006_s21  }
 0x39b   : > { %p1260_p4 = scmp.ne.s32.totalorder %s1252_s8, 0  ;;  %s635_s18 = scalar_lea.sflag [#allocation4], %s634_s16 }
 0x39d   : > { %p809_p7 = pnand %p818_p2, %p1260_p4 }
 0x39f   : > { %p810_p8 = pneg %p809_p7 }
 0x3a1   : > { %1001 = dma.done.wait (%p810_p8), %s635_s18, 128  }
 0x3a2   : > { %1003 = vsyncadd (%p810_p8), %s635_s18, 4294967168  ;;  %p18_p11 = scmp.ge.s32.totalorder %s1089_s27, 5   ;;  %s1261_s21 = smov %s1010_s22 }
 0x3a3   : > { %s1262_s22 = smov %s1014_s23  ;;  %s1263_s23 = smov %s1100_s30 }
 0x3a4   : > { %s1264_s24 = smov %s1089_s27  ;;  %20 = sbr.rel (!%p18_p11) target bundleno = 5 (0x5), region = 92 }
 0x3a9   :  { %640 = vsyncpa [#allocation3], 1 }
 0x3aa   :  { %642 = vsyncpa [#allocation3 + $0x1], 1 }
 0x3ab   :  { %643 = vsyncpa [#allocation6], 1 }
 0x3ac   :  { %644 = vsyncpa [#allocation4], 1 }
 0x3ad   :  { %646 = vsyncpa [#allocation4 + $0x1], 1 }

</bundles_post_ra>
